<compile_context>
chip_gen: v7x
topology: tpu7x:2x2x1
jax: 0.10.0
libtpu: 0.0.40
codegen_flags: <defaults>
</compile_context>

<pallas_src>
import jax
import jax.numpy as jnp
from jax.experimental import pallas as pl
from jax.experimental.pallas import tpu as pltpu

# ----------------------------- model dims (small, synthetic) -----------------
B = 2            # batch
C = 4            # input channels
H = 16           # input height
W = 16           # input width
CHW = C * H * W
HIDDEN = 32      # embed dim
NQ = 16          # num queries
NC = 8           # num classes
NUM_SELECT = 10  # top-k detections per image

HEAD_DIM = NC + 4              # fused class+box head width (12)
OUT_DIM = 2 * HEAD_DIM + 4     # head | sigmoid(head) | xyxy  = 28 real lanes
OUT_LANES = 128                # lane-dense packed output width (zero padded)


# ----------------------------- Pallas kernel ---------------------------------
def _deform_detr_kernel(
    x_ref,          # (B, CHW)            bf16 flattened images (whole batch)
    w_fused_ref,    # (CHW, HEAD_DIM)     bf16 folded embed->head weight
    head_base_ref,  # (NQ, HEAD_DIM)      f32  folded query-side affine term
    t_ref,          # (B, HEAD_DIM, 4)    f32  extended cxcywh->xyxy transform
                    #                          (class rows zero, img scale folded)
    packed_ref,     # out (B, NQ, OUT_LANES) f32 packed [head | sig | xyxy | 0-pad]
):
    # Whole folded model is one bf16 MXU push with M = B.
    head_img = jnp.dot(x_ref[...], w_fused_ref[...],
                       preferred_element_type=jnp.float32)        # [B, HEAD_DIM] f32

    # Broadcast-add of the precomputed query-side term ("decoder" + head bias).
    head = head_base_ref[...][None, :, :] + head_img[:, None, :]  # [B, NQ, HEAD_DIM]
    sig = jax.nn.sigmoid(head)                                    # [B, NQ, HEAD_DIM]

    # cxcywh -> xyxy (scaled to image size) as one batched contraction against
    # the extended transform: class lanes multiply zero rows, so no lane slice.
    xyxy = jnp.einsum("bqk,bkj->bqj", sig, t_ref[...],
                      preferred_element_type=jnp.float32)         # [B, NQ, 4]

    pad = jnp.zeros((B, NQ, OUT_LANES - OUT_DIM), jnp.float32)
    # Single lane-dense 128-wide store for the whole batch.
    packed_ref[...] = jnp.concatenate([head, sig, xyxy, pad], axis=-1)


def _run_pallas(x_flat_bf16, w_fused_bf16, head_base, t_ext):
    full2 = lambda i: (0, 0)
    full3 = lambda i: (0, 0, 0)

    return pl.pallas_call(
        _deform_detr_kernel,
        out_shape=jax.ShapeDtypeStruct((B, NQ, OUT_LANES), jnp.float32),
        grid_spec=pltpu.PrefetchScalarGridSpec(
            num_scalar_prefetch=0,
            grid=(1,),  # whole batch in one invocation (launch/DMA-latency bound)
            in_specs=[
                pl.BlockSpec((B, CHW), full2),              # x            (bf16)
                pl.BlockSpec((CHW, HEAD_DIM), full2),       # W_fused      (bf16)
                pl.BlockSpec((NQ, HEAD_DIM), full2),        # head_base    (f32)
                pl.BlockSpec((B, HEAD_DIM, 4), full3),      # t_ext        (f32)
            ],
            out_specs=pl.BlockSpec((B, NQ, OUT_LANES), full3),
        ),
        compiler_params=pltpu.CompilerParams(
            dimension_semantics=("arbitrary",),
        ),
    )(x_flat_bf16, w_fused_bf16, head_base, t_ext)


# ----------------------------- one-time parameter fold -----------------------
def fold_params(params):
    """Fold the affine embed -> decoder -> head chain offline (called once)."""
    w_head = jnp.concatenate([params["w_cls"], params["w_box"]], axis=-1)   # [HIDDEN, 12]
    b_head = jnp.concatenate([params["b_cls"], params["b_box"]], axis=-1)   # [1, 12]

    # Compose in float32 first, then cast to bf16 (avoids double rounding).
    w_fused_f32 = params["w_embed"] @ w_head                                # [CHW, 12]
    head_base = (params["query_embed"] + params["b_embed"]) @ w_head + b_head  # [NQ, 12]

    # Extended cxcywh->xyxy transform base: zero rows for the NC class lanes,
    # standard center/size -> corner transform for the 4 box lanes.
    t_box = jnp.array(
        [[1.0, 0.0, 1.0, 0.0],
         [0.0, 1.0, 0.0, 1.0],
         [-0.5, 0.0, 0.5, 0.0],
         [0.0, -0.5, 0.0, 0.5]], jnp.float32)                               # [4, 4]
    t_base_ext = jnp.concatenate(
        [jnp.zeros((NC, 4), jnp.float32), t_box], axis=0)                   # [HEAD_DIM, 4]

    return {
        "w_fused": w_fused_f32.astype(jnp.bfloat16),
        "head_base": head_base.astype(jnp.float32),
        "t_base_ext": t_base_ext,
    }


# ----------------------------- wrapper (DeformDetrIrInfer.forward) -----------
def deform_detr_ir_infer(x_nchw, folded, img_hw):
    """Equivalent of DeformDetrIrInfer.forward(data) with post_process set.

    x_nchw : [B, C, H, W] float32 image tensor (layout: NCHW)
    folded : output of fold_params (one-time)
    img_hw : [B, 2] float32 original (height, width) per image
    """
    # Per-call data prep only: flatten + bf16 cast of the image, per-image scale.
    x_flat = x_nchw.reshape(B, CHW).astype(jnp.bfloat16)
    img_h = img_hw[:, 0]
    img_w = img_hw[:, 1]
    scale = jnp.stack([img_w, img_h, img_w, img_h], axis=-1)                # [B, 4]
    t_ext = folded["t_base_ext"][None, :, :] * scale[:, None, :]            # [B, HEAD_DIM, 4]

    packed = _run_pallas(x_flat, folded["w_fused"], folded["head_base"], t_ext)

    # Unpack the lane-dense output buffer in plain JAX (no in-kernel lane slices).
    head = packed[:, :, 0:HEAD_DIM]                     # raw fused head
    sig = packed[:, :, HEAD_DIM:2 * HEAD_DIM]           # sigmoid(head)
    boxes_xyxy = packed[:, :, 2 * HEAD_DIM:OUT_DIM]     # xyxy scaled to image size

    box_cls = head[:, :, :NC]                           # raw class logits (ir_model out 0)
    prob = sig[:, :, :NC]                               # sigmoid scores
    box_pred = sig[:, :, NC:]                           # sigmoid cxcywh  (ir_model out 1)

    # TODO(synk): dynamic top-k + gather has no clean Pallas TPU equivalent;
    # this selection stage stays in plain JAX glue.
    prob_flat = prob.reshape(B, NQ * NC)
    topk_values, topk_indexes = jax.lax.top_k(prob_flat, NUM_SELECT)
    scores = topk_values
    topk_boxes = topk_indexes // NC
    labels = topk_indexes % NC
    gather_idx = jnp.broadcast_to(topk_boxes[:, :, None], (B, NUM_SELECT, 4))
    boxes = jnp.take_along_axis(boxes_xyxy, gather_idx, axis=1)

    return {
        "box_cls": box_cls,        # ir_model output 0
        "box_pred": box_pred,      # ir_model output 1
        "scores": scores,          # post_process results
        "labels": labels,
        "boxes": boxes,
    }


# ----------------------------- deterministic param init ----------------------
def init_params(key):
    ks = jax.random.split(key, 8)
    s = 0.02
    return {
        "w_embed": s * jax.random.normal(ks[0], (CHW, HIDDEN), jnp.float32),
        "b_embed": s * jax.random.normal(ks[1], (1, HIDDEN), jnp.float32),
        "query_embed": s * jax.random.normal(ks[2], (NQ, HIDDEN), jnp.float32),
        "w_cls": s * jax.random.normal(ks[3], (HIDDEN, NC), jnp.float32),
        "b_cls": s * jax.random.normal(ks[4], (1, NC), jnp.float32),
        "w_box": s * jax.random.normal(ks[5], (HIDDEN, 4), jnp.float32),
        "b_box": s * jax.random.normal(ks[6], (1, 4), jnp.float32),
    }


if __name__ == "__main__":
    key = jax.random.PRNGKey(0)
    k_x, k_p = jax.random.split(key)
    x = jax.random.normal(k_x, (B, C, H, W), jnp.float32)          # NCHW input
    params = init_params(k_p)
    folded = fold_params(params)                                    # one-time fold
    img_hw = jnp.array([[512.0, 768.0], [640.0, 640.0]], jnp.float32)

    out = deform_detr_ir_infer(x, folded, img_hw)
    jax.block_until_ready(out)

    # light sanity checks on shapes
    assert out["box_cls"].shape == (B, NQ, NC)
    assert out["box_pred"].shape == (B, NQ, 4)
    assert out["scores"].shape == (B, NUM_SELECT)
    assert out["labels"].shape == (B, NUM_SELECT)
    assert out["boxes"].shape == (B, NUM_SELECT, 4)
    print("KERNEL_OK")
</pallas_src>

<mosaic_0001>
module attributes {stable_mosaic.version = 11 : i64} {
  func.func @_deform_detr_kernel(%arg0: i32, %arg1: memref<2x1024xbf16, #tpu.memory_space<vmem>>, %arg2: memref<1024x12xbf16, #tpu.memory_space<vmem>>, %arg3: memref<16x12xf32, #tpu.memory_space<vmem>>, %arg4: memref<2x12x4xf32, #tpu.memory_space<vmem>>, %arg5: memref<2x16x128xf32, #tpu.memory_space<vmem>>) attributes {dimension_semantics = [#tpu.dimension_semantics<arbitrary>], iteration_bounds = array<i64: 1>, scalar_prefetch = 0 : i64, scratch_operands = 0 : i64, tpu.core_type = #tpu.core_type<tc>, window_params = [{pipeline_mode = #tpu.pipeline_mode<synchronous>, transform_indices = @transform_0, window_bounds = array<i64: 2, 1024>}, {pipeline_mode = #tpu.pipeline_mode<synchronous>, transform_indices = @transform_1, window_bounds = array<i64: 1024, 12>}, {pipeline_mode = #tpu.pipeline_mode<synchronous>, transform_indices = @transform_2, window_bounds = array<i64: 16, 12>}, {pipeline_mode = #tpu.pipeline_mode<synchronous>, transform_indices = @transform_3, window_bounds = array<i64: 2, 12, 4>}, {pipeline_mode = #tpu.pipeline_mode<synchronous>, transform_indices = @transform_4, window_bounds = array<i64: 2, 16, 128>}]} {
    %c0 = arith.constant 0 : index
    %c0_0 = arith.constant 0 : index
    %0 = vector.load %arg1[%c0, %c0_0] : memref<2x1024xbf16, #tpu.memory_space<vmem>>, vector<2x1024xbf16>
    %c0_1 = arith.constant 0 : index
    %c0_2 = arith.constant 0 : index
    %1 = vector.load %arg2[%c0_1, %c0_2] : memref<1024x12xbf16, #tpu.memory_space<vmem>>, vector<1024x12xbf16>
    %cst = arith.constant dense<0.000000e+00> : vector<2x12xf32>
    %2 = tpu.matmul %0, %1, %cst {dimension_numbers = #tpu.dot_dimension_numbers<[1], [0], [0], [1], [0, 0, 1, 1], [], []>} : vector<2x1024xbf16>, vector<1024x12xbf16>, vector<2x12xf32> -> vector<2x12xf32>
    %c0_3 = arith.constant 0 : index
    %c0_4 = arith.constant 0 : index
    %3 = vector.load %arg3[%c0_3, %c0_4] : memref<16x12xf32, #tpu.memory_space<vmem>>, vector<16x12xf32>
    %4 = vector.shape_cast %3 : vector<16x12xf32> to vector<1x16x12xf32>
    %5 = vector.shape_cast %2 : vector<2x12xf32> to vector<2x1x12xf32>
    %6 = vector.broadcast %4 : vector<1x16x12xf32> to vector<2x16x12xf32>
    %7 = vector.broadcast %5 : vector<2x1x12xf32> to vector<2x16x12xf32>
    %8 = arith.addf %6, %7 : vector<2x16x12xf32>
    %9 = arith.negf %8 : vector<2x16x12xf32>
    %10 = math.exp %9 : vector<2x16x12xf32>
    %cst_5 = arith.constant 1.000000e+00 : f32
    %11 = vector.broadcast %cst_5 : f32 to vector<2x16x12xf32>
    %12 = arith.addf %11, %10 : vector<2x16x12xf32>
    %13 = arith.divf %11, %12 : vector<2x16x12xf32>
    %c0_6 = arith.constant 0 : index
    %c0_7 = arith.constant 0 : index
    %c0_8 = arith.constant 0 : index
    %14 = vector.load %arg4[%c0_6, %c0_7, %c0_8] : memref<2x12x4xf32, #tpu.memory_space<vmem>>, vector<2x12x4xf32>
    "tpu.trace_start"() <{level = 10 : i32, message = "bqk,bkj->bqj"}> : () -> ()
    %cst_9 = arith.constant dense<0.000000e+00> : vector<2x16x4xf32>
    %15 = tpu.matmul %13, %14, %cst_9 {dimension_numbers = #tpu.dot_dimension_numbers<[2], [1], [1], [2], [0, 0, 0, 1, 1, 2], [0], [0]>} : vector<2x16x12xf32>, vector<2x12x4xf32>, vector<2x16x4xf32> -> vector<2x16x4xf32>
    %cst_10 = arith.constant 0.000000e+00 : f32
    "tpu.trace_stop"() : () -> ()
    %16 = vector.broadcast %cst_10 : f32 to vector<2x16x100xf32>
    %17 = tpu.concatenate %8, %13, %15, %16 in 2 : vector<2x16x12xf32>, vector<2x16x12xf32>, vector<2x16x4xf32>, vector<2x16x100xf32> -> vector<2x16x128xf32>
    %c0_11 = arith.constant 0 : index
    %c0_12 = arith.constant 0 : index
    %c0_13 = arith.constant 0 : index
    %18 = vector.load %arg5[%c0_11, %c0_12, %c0_13] : memref<2x16x128xf32, #tpu.memory_space<vmem>>, vector<2x16x128xf32>
    tpu.vector_store %arg5[%c0_11, %c0_12, %c0_13], %17 {strides = array<i32>} : memref<2x16x128xf32, #tpu.memory_space<vmem>>, vector<2x16x128xf32>,
    return
  }
  func.func @transform_0(%arg0: i32) -> (i32, i32) {
    %c0_i32 = arith.constant 0 : i32
    %c0_i32_0 = arith.constant 0 : i32
    %c0_i32_1 = arith.constant 0 : i32
    return %c0_i32, %c0_i32_0 : i32, i32
  }
  func.func @transform_1(%arg0: i32) -> (i32, i32) {
    %c0_i32 = arith.constant 0 : i32
    %c0_i32_0 = arith.constant 0 : i32
    %c0_i32_1 = arith.constant 0 : i32
    return %c0_i32, %c0_i32_0 : i32, i32
  }
  func.func @transform_2(%arg0: i32) -> (i32, i32) {
    %c0_i32 = arith.constant 0 : i32
    %c0_i32_0 = arith.constant 0 : i32
    %c0_i32_1 = arith.constant 0 : i32
    return %c0_i32, %c0_i32_0 : i32, i32
  }
  func.func @transform_3(%arg0: i32) -> (i32, i32, i32) {
    %c0_i32 = arith.constant 0 : i32
    %c0_i32_0 = arith.constant 0 : i32
    %c0_i32_1 = arith.constant 0 : i32
    %c0_i32_2 = arith.constant 0 : i32
    return %c0_i32, %c0_i32_0, %c0_i32_1 : i32, i32, i32
  }
  func.func @transform_4(%arg0: i32) -> (i32, i32, i32) {
    %c0_i32 = arith.constant 0 : i32
    %c0_i32_0 = arith.constant 0 : i32
    %c0_i32_1 = arith.constant 0 : i32
    %c0_i32_2 = arith.constant 0 : i32
    return %c0_i32, %c0_i32_0, %c0_i32_1 : i32, i32, i32
  }
}

</mosaic_0001>

<bundles_post_ra>
// kernel: tpu_custom_call.1
= control target key start
LH: loop header
LB: loop body
LE: loop exit
PB: predicated region body
PF: predicated region fallthrough
CT: control target
= control target key end

     0   :  { %v153_v28 = vlaneseq  ;;  %v1357_v36 = vmov 1966171168   ;;  %s1654_s0 = inlined_call_operand.vmem [shape: bf16[2,1024], index: 0, kind: input, shape index: {}]   ;;  %s1655_s1 = inlined_call_operand.vmem [shape: bf16[1024,12], index: 1, kind: input, shape index: {}]   ;;  %s1656_s2 = inlined_call_operand.vmem [shape: f32[16,12], index: 2, kind: input, shape index: {}]   ;;  %s1657_s3 = inlined_call_operand.vmem [shape: f32[2,12,4], index: 3, kind: input, shape index: {}]   ;;  %s1658_s4 = inlined_call_operand.hbm [shape: f32[2,16,128], index: 4, kind: output, shape index: {}]  }
   0x1   :  { %v1252_v0 = vld [vmem:[%s1655_s1 + $0x40] sm:$0xff]   ;;  %v1256_v4 = vld [vmem:[%s1655_s1 + $0x48] sm:$0xff]   ;;  %v1260_v8 = vld [vmem:[%s1655_s1 + $0x50] sm:$0xff]   ;;  %v151_v37 = vunpack.c.l.s4 %v1357_v36 }
   0x2   :  { %v1253_v1 = vld [vmem:[%s1655_s1 + $0xc0] sm:$0xff]   ;;  %1123 = vmatprep.subr.bf16.mxu0 %v1252_v0  ;;  %v1257_v5 = vld [vmem:[%s1655_s1 + $0xc8] sm:$0xff]   ;;  %v1261_v9 = vld [vmem:[%s1655_s1 + $0xd0] sm:$0xff]   ;;  %v1485_v33 = vshrl.u32 %v153_v28, 7 }
   0x3   :  { %v1254_v2 = vld [vmem:[%s1655_s1] sm:$0xff]   ;;  %1145 = vmatprep.subr.bf16.mxu1 %v1253_v1  ;;  %v1258_v6 = vld [vmem:[%s1655_s1 + $0x8] sm:$0xff]   ;;  %v1262_v10 = vld [vmem:[%s1655_s1 + $0x10] sm:$0xff]   ;;  %v152_v40 = vunpack.c.0.s8 %v151_v37 }
   0x4   :  { %v1255_v3 = vld [vmem:[%s1655_s1 + $0x80] sm:$0xff]   ;;  %1124 = vmatpush3.bf16.msra.mxu0 %v1254_v2  ;;  %v1259_v7 = vld [vmem:[%s1655_s1 + $0x88] sm:$0xff]   ;;  %v1263_v11 = vld [vmem:[%s1655_s1 + $0x90] sm:$0xff]  }
   0x5   :  { %1146 = vmatpush3.bf16.msra.mxu1 %v1255_v3  ;;  %1125 = vmatprep.subr.bf16.mxu0 %v1256_v4  ;;  %v1264_v12 = vld [vmem:[%s1655_s1 + $0x58] sm:$0xff]   ;;  %v1268_v16 = vld [vmem:[%s1655_s1 + $0x60] sm:$0xff]   ;;  %v1272_v20 = vld [vmem:[%s1655_s1 + $0x68] sm:$0xff]   ;;  %v1497_v41 = vsub.s32 %v152_v40, %v1485_v33 }
   0x6   :  { %1147 = vmatprep.subr.bf16.mxu1 %v1257_v5  ;;  %v1265_v13 = vld [vmem:[%s1655_s1 + $0xd8] sm:$0xff]   ;;  %v1269_v17 = vld [vmem:[%s1655_s1 + $0xe0] sm:$0xff]   ;;  %v1273_v21 = vld [vmem:[%s1655_s1 + $0xe8] sm:$0xff]  }
   0x7   :  { %v1266_v14 = vld [vmem:[%s1655_s1 + $0x18] sm:$0xff]   ;;  %v1270_v18 = vld [vmem:[%s1655_s1 + $0x20] sm:$0xff]   ;;  %v1274_v22 = vld [vmem:[%s1655_s1 + $0x28] sm:$0xff]  }
   0x8   :  { %1126 = vmatpush3.bf16.msra.mxu0 %v1258_v6  ;;  %v1267_v15 = vld [vmem:[%s1655_s1 + $0x98] sm:$0xff]   ;;  %v1271_v19 = vld [vmem:[%s1655_s1 + $0xa0] sm:$0xff]   ;;  %v1275_v23 = vld [vmem:[%s1655_s1 + $0xa8] sm:$0xff]  }
   0x9   :  { %1148 = vmatpush3.bf16.msra.mxu1 %v1259_v7  ;;  %1127 = vmatprep.subr.bf16.mxu0 %v1260_v8  ;;  %v1276_v24 = vld [vmem:[%s1655_s1 + $0x70] sm:$0xff]   ;;  %v1280_v29 = vld [vmem:[%s1655_s1 + $0x78] sm:$0xff]   ;;  %v19_v34 = vld [vmem:[%s1654_s0] sm:$0xff] }
   0xa   :  { %1149 = vmatprep.subr.bf16.mxu1 %v1261_v9  ;;  %v1277_v25 = vld [vmem:[%s1655_s1 + $0xf0] sm:$0xff]   ;;  %v1281_v30 = vld [vmem:[%s1655_s1 + $0xf8] sm:$0xff]   ;;  %v1285_v35 = vld [vmem:[%s1655_s1 + $0x140] sm:$0xff]   ;;  %v149_v39 = vcombine.high %v19_v34, %v19_v34  ;;  %v156_v42 = vrot.slane %v19_v34, %v1497_v41 }
   0xb   :  { %v1278_v26 = vld [vmem:[%s1655_s1 + $0x30] sm:$0xff]   ;;  %v1282_v31 = vld [vmem:[%s1655_s1 + $0x38] sm:$0xff]   ;;  %v1286_v38 = vld [vmem:[%s1655_s1 + $0x1c0] sm:$0xff]  }
   0xc   :  { %1128 = vmatpush3.bf16.msra.mxu0 %v1262_v10  ;;  %v1279_v27 = vld [vmem:[%s1655_s1 + $0xb0] sm:$0xff]   ;;  %v1283_v32 = vld [vmem:[%s1655_s1 + $0xb8] sm:$0xff]   ;;  %v1501_v43 = vrot.slane %v149_v39, %v1497_v41  ;;  %v164_v44 = vcombine.high %v156_v42, %v156_v42  ;;  %v172_v45 = vrot.slane %v156_v42, %v1497_v41  ;;  %v1287_v48 = vld [vmem:[%s1655_s1 + $0x100] sm:$0xff]  }
   0xd   :  { %1150 = vmatpush3.bf16.msra.mxu1 %v1263_v11  ;;  %1129 = vmatprep.subr.bf16.mxu0 %v1264_v12  ;;  %v1289_v51 = vld [vmem:[%s1655_s1 + $0x148] sm:$0xff]   ;;  %v1288_v53 = vld [vmem:[%s1655_s1 + $0x180] sm:$0xff]   ;;  %v1293_v57 = vld [vmem:[%s1655_s1 + $0x150] sm:$0xff]  }
   0xe   :  { %1151 = vmatprep.subr.bf16.mxu1 %v1265_v13  ;;  %v165_v46 = vcombine.high %v1501_v43, %v1501_v43  ;;  %v186_v47 = vrot.slane %v164_v44, %v1497_v41  ;;  %v194_v50 = vcombine.high %v172_v45, %v172_v45  ;;  %v1290_v54 = vld [vmem:[%s1655_s1 + $0x1c8] sm:$0xff]   ;;  %v1294_v59 = vld [vmem:[%s1655_s1 + $0x1d0] sm:$0xff]   ;;  %v1297_v61 = vld [vmem:[%s1655_s1 + $0x158] sm:$0xff]  }
   0xf   :  { %v1291_v56 = vld [vmem:[%s1655_s1 + $0x108] sm:$0xff]   ;;  %v1295_v60 = vld [vmem:[%s1655_s1 + $0x110] sm:$0xff]   ;;  %v1298_v63 = vld [vmem:[%s1655_s1 + $0x1d8] sm:$0xff]  }
  0x10   :  { %1130 = vmatpush3.bf16.msra.mxu0 %v1266_v14  ;;  %v193_v49 = vrot.slane %v165_v46, %v1497_v41  ;;  %622 = vmatprep.mubr.bf16.mxu0 %v186_v47  ;;  %v196_v52 = vcombine.high %v186_v47, %v186_v47  ;;  %v1292_v58 = vld [vmem:[%s1655_s1 + $0x188] sm:$0xff]   ;;  %v1296_v62 = vld [vmem:[%s1655_s1 + $0x190] sm:$0xff]   ;;  %v1299_v0 = vld [vmem:[%s1655_s1 + $0x118] sm:$0xff]  }
  0x11   :  { %1152 = vmatpush3.bf16.msra.mxu1 %v1267_v15  ;;  %1131 = vmatprep.subr.bf16.mxu0 %v1268_v16  ;;  %v1301_v1 = vld [vmem:[%s1655_s1 + $0x160] sm:$0xff]   ;;  %v1300_v2 = vld [vmem:[%s1655_s1 + $0x198] sm:$0xff]   ;;  %v1305_v5 = vld [vmem:[%s1655_s1 + $0x168] sm:$0xff]  }
  0x12   :  { %1153 = vmatprep.subr.bf16.mxu1 %v1269_v17  ;;  %v197_v55 = vcombine.high %v193_v49, %v193_v49  ;;  %662 = vmatprep.mubr.bf16.mxu1 %v196_v52  ;;  %v1302_v3 = vld [vmem:[%s1655_s1 + $0x1e0] sm:$0xff]   ;;  %v1306_v7 = vld [vmem:[%s1655_s1 + $0x1e8] sm:$0xff]   ;;  %v1309_v9 = vld [vmem:[%s1655_s1 + $0x170] sm:$0xff]  }
  0x13   :  { %v1303_v4 = vld [vmem:[%s1655_s1 + $0x120] sm:$0xff]   ;;  %v1307_v8 = vld [vmem:[%s1655_s1 + $0x128] sm:$0xff]  }
  0x14   :  { %1132 = vmatpush3.bf16.msra.mxu0 %v1270_v18  ;;  %v1304_v6 = vld [vmem:[%s1655_s1 + $0x1a0] sm:$0xff]  }
  0x15   :  { %1154 = vmatpush3.bf16.msra.mxu1 %v1271_v19  ;;  %1133 = vmatprep.subr.bf16.mxu0 %v1272_v20 }
  0x16   :  { %1155 = vmatprep.subr.bf16.mxu1 %v1273_v21 }
  0x18   :  { %1134 = vmatpush3.bf16.msra.mxu0 %v1274_v22 }
  0x19   :  { %1156 = vmatpush3.bf16.msra.mxu1 %v1275_v23  ;;  %1135 = vmatprep.subr.bf16.mxu0 %v1276_v24 }
  0x1a   :  { %1157 = vmatprep.subr.bf16.mxu1 %v1277_v25 }
  0x1c   :  { %1136 = vmatpush3.bf16.msra.mxu0 %v1278_v26 }
  0x1d   :  { %1158 = vmatpush3.bf16.msra.mxu1 %v1279_v27  ;;  %1137 = vmatprep.subr.bf16.mxu0 %v1280_v29 }
  0x1e   :  { %1159 = vmatprep.subr.bf16.mxu1 %v1281_v30 }
  0x20   :  { %1138 = vmatpush3.bf16.msra.mxu0 %v1282_v31 }
  0x21   :  { %1160 = vmatpush3.bf16.msra.mxu1 %v1283_v32  ;;  %1167 = vmatprep.subr.bf16.mxu0 %v1285_v35 }
  0x22   :  { %1189 = vmatprep.subr.bf16.mxu1 %v1286_v38 }
  0x23   :  { %623 = vmatmul.mubr.bf16.vlgmr.msra.gmra.mrb[0].mxu0 %v172_v45 }
  0x24   :  { %1168 = vmatpush3.bf16.msra.mxu0 %v1287_v48  ;;  %663 = vmatmul.mubr.bf16.vlgmr.msra.gmra.mrb[0].mxu1 %v194_v50 }
  0x25   :  { %1169 = vmatprep.subr.bf16.mxu0 %v1289_v51  ;;  %1190 = vmatpush3.bf16.msra.mxu1 %v1288_v53 }
  0x26   :  { %702 = vmatprep.mubr.bf16.mxu0 %v193_v49  ;;  %1191 = vmatprep.subr.bf16.mxu1 %v1290_v54 }
  0x27   :  { %742 = vmatprep.mubr.bf16.mxu1 %v197_v55 }
  0x28   :  { %1170 = vmatpush3.bf16.msra.mxu0 %v1291_v56 }
  0x29   :  { %1171 = vmatprep.subr.bf16.mxu0 %v1293_v57  ;;  %1192 = vmatpush3.bf16.msra.mxu1 %v1292_v58 }
  0x2a   :  { %1193 = vmatprep.subr.bf16.mxu1 %v1294_v59 }
  0x2c   :  { %1172 = vmatpush3.bf16.msra.mxu0 %v1295_v60 }
  0x2d   :  { %1173 = vmatprep.subr.bf16.mxu0 %v1297_v61  ;;  %1194 = vmatpush3.bf16.msra.mxu1 %v1296_v62 }
  0x2e   :  { %1195 = vmatprep.subr.bf16.mxu1 %v1298_v63 }
  0x30   :  { %1174 = vmatpush3.bf16.msra.mxu0 %v1299_v0 }
  0x31   :  { %1175 = vmatprep.subr.bf16.mxu0 %v1301_v1  ;;  %1196 = vmatpush3.bf16.msra.mxu1 %v1300_v2 }
  0x32   :  { %1197 = vmatprep.subr.bf16.mxu1 %v1302_v3 }
  0x34   :  { %1176 = vmatpush3.bf16.msra.mxu0 %v1303_v4 }
  0x35   :  { %1177 = vmatprep.subr.bf16.mxu0 %v1305_v5 }
  0x36   :  { %9 = vsyncpa [#allocation3], 0  ;;  %1198 = vmatpush3.bf16.msra.mxu1 %v1304_v6  ;;  %v1308_v10 = vld [vmem:[%s1655_s1 + $0x1a8] sm:$0xff]   ;;  %v1310_v11 = vld [vmem:[%s1655_s1 + $0x1f0] sm:$0xff]   ;;  %v179_v17 = vrot.slane %v1501_v43, %v1497_v41  ;;  %vm824_vm0 = vcmask 1043456   ;;  %vm1358_vm1 = vmmov 1  }
  0x37   :  { %1199 = vmatprep.subr.bf16.mxu1 %v1306_v7  ;;  %v1311_v12 = vld [vmem:[%s1655_s1 + $0x130] sm:$0xff]   ;;  %v1313_v13 = vld [vmem:[%s1655_s1 + $0x178] sm:$0xff]   ;;  %v813_v20 = vld [vmem:[%s1657_s3] sm:$0xff]  ;;  %v777_v52 = vsub.s32 0, %v1485_v33  ;;  %vm817_vm3 = vcmask 97280   ;;  %s1360_s22 = smov 24  }
  0x38   :  { %1178 = vmatpush3.bf16.msra.mxu0 %v1307_v8  ;;  %v1312_v14 = vld [vmem:[%s1655_s1 + $0x1b0] sm:$0xff]   ;;  %v1314_v15 = vld [vmem:[%s1655_s1 + $0x1f8] sm:$0xff]   ;;  %v195_v19 = vcombine.high %v179_v17, %v179_v17  ;;  %v814_v21 = vld [vmem:[%s1657_s3 + $0x8] sm:$0xf]  ;;  %vm1019_vm4 = vcmask 195584   ;;  %vm1024_vm5 = vcmask 228352  }
  0x39   :  { %1179 = vmatprep.subr.bf16.mxu0 %v1309_v9  ;;  %v1315_v16 = vld [vmem:[%s1655_s1 + $0x138] sm:$0xff]   ;;  %v815_v22 = vld [vmem:[%s1657_s3 + $0x10] sm:$0xff]  ;;  %v1233_v23 = vpack.c.bf16 %v814_v21, %v813_v20  ;;  %vm1234_vm2 = vmpackc.low %vm824_vm0, %vm1358_vm1  ;;  %s1361_s23 = smov [#allocation2]  }
  0x3a   :  { %1200 = vmatpush3.bf16.msra.mxu1 %v1308_v10  ;;  %v1316_v18 = vld [vmem:[%s1655_s1 + $0x1b8] sm:$0xff]   ;;  %v750_v55 = vld [vmem:[%s1656_s2] sm:$0xff]  ;;  %v751_v56 = vld [vmem:[%s1656_s2 + $0x8] sm:$0xff]  ;;  %s1359_s2 = smov 12   ;;  %s1038_s24 = sshll.u32 %s1361_s23, 4  ;;  %s1039_s24 = int_to_ptr.vmem [resolvable:$true] %s1038_s24 }
  0x3b   :  { %1201 = vmatprep.subr.bf16.mxu1 %v1310_v11  ;;  %v816_v24 = vld [vmem:[%s1657_s3 + $0x18] sm:$0xf]  ;;  %s1333_s25 = scalar_lea.vmem %s1039_s24, 512  ;;  %p1338_p1 = scmp.lt.s32.totalorder %s1039_s24, %s1039_s24 }
  0x3c   :  { %1180 = vmatpush3.bf16.msra.mxu0 %v1311_v12  ;;  %v1239_v25 = vpack.c.bf16 %v816_v24, %v815_v22  ;;  %p1334_p0 = scmp.ne.s32.totalorder %s1039_s24, %s1333_s25  ;;  %p1339_p2 = scmp.lt.s32.totalorder %s1333_s25, %s1333_s25 }
  0x3d   :  { %1181 = vmatprep.subr.bf16.mxu0 %v1313_v13 }
  0x3e   :  { %1202 = vmatpush3.bf16.msra.mxu1 %v1312_v14  ;;  %p1340_p3 = por %p1339_p2, %p1338_p1 }
  0x3f   :  { %1203 = vmatprep.subr.bf16.mxu1 %v1314_v15 }
  0x40   :  { %1182 = vmatpush3.bf16.msra.mxu0 %v1315_v16  ;;  %p1341_p4 = pnand %p1340_p3, %p1334_p0 }
  0x41   :  { %1235 = vmatprep.subr.msk.bf16.mxu0 %vm1234_vm2, %v1233_v23 }
  0x42   :  { %1204 = vmatpush3.bf16.msra.mxu1 %v1316_v18 }
  0x43   :  { %703 = vmatmul.mubr.bf16.vlgmr.msra.gmra.mrb[4].mxu0 %v179_v17  ;;  %1241 = vmatprep.subr.msk.bf16.mxu1 %vm1234_vm2, %v1239_v25 }
  0x44   :  { %1238 = vmatpush3.bf16.msk.msra.mxu0 %vm1234_vm2, %v1233_v23 }
  0x45   :  { %743 = vmatmul.mubr.bf16.vlgmr.msra.gmra.mrb[4].mxu1 %v195_v19 }
  0x46   :  { %1244 = vmatpush3.bf16.msk.msra.mxu1 %vm1234_vm2, %v1239_v25 }
  0xf6   :  { %v1139_v26 = vpop.f32.mrb[0].mxu0 }
  0xf7   :  { %v1140_v27 = vpop.f32.mrb[1].mxu0  ;;  %v1161_v28 = vpop.f32.mrb[0].mxu1 }
  0xf8   :  { %v1141_v29 = vadd.f32 %v1140_v27, %v1139_v26  ;;  %v1142_v30 = vpop.f32.mrb[2].mxu0  ;;  %v1162_v31 = vpop.f32.mrb[1].mxu1 }
  0xf9   :  { %v1143_v32 = vpop.f32.mrb[3].mxu0  ;;  %v1163_v34 = vadd.f32 %v1162_v31, %v1161_v28  ;;  %v1164_v35 = vpop.f32.mrb[2].mxu1 }
  0xfa   :  { %v1165_v36 = vpop.f32.mrb[3].mxu1 }
  0xfb   :  { %v665_v37 = vadd.f32 %v1163_v34, %v1141_v29 }
 0x116   :  { %v1183_v38 = vpop.f32.mrb[4].mxu0 }
 0x117   :  { %v1184_v39 = vpop.f32.mrb[5].mxu0 }
 0x118   :  { %v1205_v40 = vpop.f32.mrb[4].mxu1  ;;  %v1185_v42 = vadd.f32 %v1184_v39, %v1183_v38  ;;  %v1186_v43 = vpop.f32.mrb[6].mxu0 }
 0x119   :  { %v1206_v44 = vpop.f32.mrb[5].mxu1  ;;  %v1187_v45 = vpop.f32.mrb[7].mxu0 }
 0x11a   :  { %v705_v46 = vadd.f32 %v1185_v42, %v665_v37  ;;  %v1207_v47 = vadd.f32 %v1206_v44, %v1205_v40  ;;  %v1208_v48 = vpop.f32.mrb[6].mxu1 }
 0x11b   :  { %v1209_v49 = vpop.f32.mrb[7].mxu1 }
 0x11c   :  { %v745_v50 = vadd.f32 %v1207_v47, %v705_v46 }
 0x11e   :  { %v759_v51 = vrot.slane %v745_v50, %v1497_v41 }
 0x120   :  { %v760_v53 = vcombine.high %v759_v51, %v759_v51  ;;  %v767_v54 = vrot.slane %v759_v51, %v1497_v41 }
 0x122   :  { %v774_v57 = vrot.slane %v760_v53, %v1497_v41  ;;  %v778_v58 = vrot.slane %v767_v54, %v777_v52 }
 0x124   :  { %v782_v59 = vrot.slane %v774_v57, %v777_v52  ;;  %v785_v60 = vadd.f32 %v778_v58, %v750_v55  ;;  %v786_v61 = vadd.f32 %v778_v58, %v751_v56 }
 0x126   :  { %v1622_v62 = vadd.f32 %v782_v59, %v750_v55  ;;  %v788_v33 = vadd.f32 %v782_v59, %v751_v56  ;;  %v1113_v63 = vmul.f32 -1.442695, %v785_v60  ;;  %v1114_v0 = vmul.f32 -1.442695, %v786_v61 }
 0x128   :  { %1317 = vpow2.f32 %v1113_v63  ;;  %v1116_v1 = vmul.f32 -1.442695, %v788_v33  ;;  %v1115_v2 = vmul.f32 -1.442695, %v1622_v62 }
 0x129   :  { %1319 = vpow2.f32 %v1114_v0 }
 0x12a   :  { %1321 = vpow2.f32 %v1116_v1 }
 0x12b   :  { %1323 = vpow2.f32 %v1115_v2 }
 0x132   :  { %v1318_v3 = vpop.eup %1317 }
 0x133   :  { %v1320_v4 = vpop.eup %1319  ;;  %v801_v5 = vadd.f32 1.0, %v1318_v3 }
 0x134   :  { %v1322_v41 = vpop.eup %1321  ;;  %v802_v6 = vadd.f32 1.0, %v1320_v4 }
 0x135   :  { %v1324_v7 = vpop.eup %1323  ;;  %v804_v8 = vadd.f32 1.0, %v1322_v41  ;;  %1325 = vrcp.f32 %v801_v5 }
 0x136   :  { %1327 = vrcp.f32 %v802_v6  ;;  %v803_v9 = vadd.f32 1.0, %v1324_v7 }
 0x137   :  { %1329 = vrcp.f32 %v804_v8 }
 0x138   :  { %1331 = vrcp.f32 %v803_v9 }
 0x13f   :  { %v1326_v10 = vpop.eup %1325 }
 0x140   :  { %v1328_v11 = vpop.eup %1327  ;;  %987 = vrot.lane.b32.xlu0 %v1326_v10, %s1359_s2  ;;  %1223 = vmatprep.mubr.msk.f32.mxu0 %vm817_vm3, %v1326_v10 }
 0x141   :  { %v1330_v12 = vpop.eup %1329  ;;  %1224 = vmatmul.mubr.msk.f32.vlgmr.msra.gmra.mrb[8].mxu0 %vm817_vm3, %v1328_v11 }
 0x142   :  { %v1332_v13 = vpop.eup %1331 }
 0x143   :  { %991 = vrot.lane.b32.xlu1 %v1332_v13, %s1359_s2  ;;  %1230 = vmatprep.mubr.msk.f32.mxu1 %vm817_vm3, %v1332_v13 }
 0x144   :  { %1231 = vmatmul.mubr.msk.f32.vlgmr.msra.gmra.mrb[8].mxu1 %vm817_vm3, %v1330_v12  ;;  %989 = vrot.lane.b32.xlu0 %v1328_v11, %s1359_s2 }
 0x147   :  { %993 = vrot.lane.b32.xlu1 %v1330_v12, %s1359_s2 }
 0x1b2   :  { %v988_v19 = vpop.permute.xlu0 %987 }
 0x1b3   :  { %v1015_v24 = vsel %vm817_vm3, %v785_v60, %v988_v19 }
 0x1b5   :  { %v992_v18 = vpop.permute.xlu1 %991 }
 0x1b6   :  { %v990_v21 = vpop.permute.xlu0 %989  ;;  %v1017_v32 = vsel %vm817_vm3, %v1622_v62, %v992_v18 }
 0x1b7   :  { %v1016_v22 = vsel %vm817_vm3, %v786_v61, %v990_v21 }
 0x1b9   :  { %v994_v20 = vpop.permute.xlu1 %993 }
 0x1ba   :  { %v1018_v30 = vsel %vm817_vm3, %v788_v33, %v994_v20 }
 0x214   :  { %v1225_v14 = vpop.f32.mrb[8].mxu0 }
 0x215   :  { %v894_v15 = vpop.f32.mrb[9].mxu0  ;;  %1005 = vrot.lane.b32.xlu1 %v1225_v14, %s1360_s22 }
 0x216   :  { %1003 = vrot.lane.b32.xlu0 %v894_v15, %s1360_s22 }
 0x217   :  { %v1232_v16 = vpop.f32.mrb[8].mxu1 }
 0x218   :  { %v978_v17 = vpop.f32.mrb[9].mxu1 }
 0x219   :  { %1009 = vrot.lane.b32.xlu1 %v1232_v16, %s1360_s22 }
 0x21a   :  { %1007 = vrot.lane.b32.xlu0 %v978_v17, %s1360_s22 }
 0x287   :  { %v1006_v23 = vpop.permute.xlu1 %1005 }
 0x288   :  { %v1021_v25 = vsel %vm1019_vm4, %v1016_v22, %v1006_v23  ;;  %v1004_v26 = vpop.permute.xlu0 %1003 }
 0x289   :  { %v1026_v27 = vsel %vm1024_vm5, %v1021_v25, 0.0  ;;  %v1020_v28 = vsel %vm1019_vm4, %v1015_v24, %v1004_v26 }
 0x28a   :  { %1030 = vst [vmem:[#allocation2 + $0x8] sm:$0xff] %v1026_v27  ;;  %v1025_v29 = vsel %vm1024_vm5, %v1020_v28, 0.0 }
 0x28b   :  { %1029 = vst [vmem:[#allocation2] sm:$0xff] %v1025_v29  ;;  %v1010_v31 = vpop.permute.xlu1 %1009 }
 0x28c   :  { %v1023_v34 = vsel %vm1019_vm4, %v1018_v30, %v1010_v31  ;;  %v1008_v35 = vpop.permute.xlu0 %1007 }
 0x28d   :  { %v1028_v36 = vsel %vm1024_vm5, %v1023_v34, 0.0  ;;  %v1022_v37 = vsel %vm1019_vm4, %v1017_v32, %v1008_v35 }
 0x28e   :  { %1032 = vst [vmem:[#allocation2 + $0x18] sm:$0xff] %v1028_v36  ;;  %v1027_v38 = vsel %vm1024_vm5, %v1022_v37, 0.0 }
 0x28f   :  { %1031 = vst [vmem:[#allocation2 + $0x10] sm:$0xff] %v1027_v38 }
 0x290   :  { %1344 = shalt.err (!%p1341_p4)
}
 0x291   :  { %s1345_s28 = scalar_lea.hbm %s1658_s4, 512 }
 0x292   :  { %p1346_p5 = scmp.ne.s32.totalorder %s1658_s4, %s1345_s28  ;;  %p1349_p6 = scmp.lt.u32.totalorder %s1345_s28, %s1658_s4 }
 0x294   :  { %p1351_p7 = pnand %p1349_p6, %p1346_p5 }
 0x296   :  { %1354 = shalt.err (!%p1351_p7)
}
 0x297   :  { %s1362_s0 = smov 128   ;;  %s1363_s7 = smov 8  }
 0x298   :  { %1044 = dma.vmem_to_hbm [thread:$0]  %s1039_s24, 512, %s1658_s4, [#allocation3], %s1362_s0, %s1362_s0, %s1363_s7  }
 0x299   :  { %1355 = dma.done.wait [#allocation3], 512  }
 0x29a   :  { %1356 = vsyncadd [#allocation3], 4294966784 }
 0x29b   :  { %1048 = vsyncpa [#allocation3], 1 }

</bundles_post_ra>
